<compile_context>
chip_gen: v5e
topology: v5e:2x2
jax: 0.10.0
libtpu: 0.0.40
codegen_flags: <defaults>
</compile_context>

<pallas_src>
import functools

import jax
import jax.numpy as jnp
from jax.experimental import pallas as pl
from jax.experimental.pallas import tpu as pltpu

NUM_CLASSES = 8
LAMBDA_COORD = 5.0
LAMBDA_NOOBJ = 0.5   # present in the module __init__ but unused in forward()

TILE_N_MAX = 32768   # anchor cells (lanes) per grid step (f32: ~2-3 MiB payload)


def _yolo_loss_kernel(pred_ref, tgt_ref, out_ref, *, m_rows, tile_n, need_valid):
    """Lane-dense streaming reduction.

    pred_ref: (5 + num_classes, tile_n) channels-major block (native dtype)
    tgt_ref : (5, tile_n)
    out_ref : (8, 128) resident accumulator; every lane holds the same value
        sublanes 0..3 : masked squared coord error (per coordinate)
        sublane  4    : positive-anchor count
        sublane  5    : BCE confidence loss (sum over all cells)
        sublane  6    : masked softmax cross-entropy (sum over positives)
        sublane  7    : unused (kept zero)
    """
    step = pl.program_id(0)

    @pl.when(step == 0)
    def _():
        out_ref[...] = jnp.zeros_like(out_ref)

    # Upcast AFTER load: bf16 inputs stay bf16 on the wire; all math is f32.
    pred = pred_ref[...].astype(jnp.float32)      # (5+NC, T)
    tgt = tgt_ref[...].astype(jnp.float32)        # (5, T)

    pred_boxes = pred[0:4, :]                     # (4, T)
    pred_conf = pred[4:5, :]                      # (1, T) probability in (0, 1)
    pred_cls = pred[5:, :]                        # (NC, T) logits

    tgt_cls_f = tgt[0:1, :]                       # (1, T) class id (0 == background)
    tgt_boxes = tgt[1:5, :]                       # (4, T)

    mask = tgt_cls_f > 0.0                        # (1, T) positive anchors
    if need_valid:
        # Ragged tail: lanes past m_rows hold garbage; they only ever reach the
        # result through jnp.where *selects*, so inf/nan there cannot leak.
        lane = jax.lax.broadcasted_iota(jnp.int32, (1, tile_n), 1)
        valid = (step * tile_n + lane) < m_rows
        mask = jnp.logical_and(mask, valid)

    mask_f = mask.astype(jnp.float32)

    # --- coord loss: masked squared error, kept per-coordinate.
    diff = pred_boxes - tgt_boxes
    coord = jnp.where(mask, diff * diff, 0.0)                    # (4, T)

    # --- conf loss: BCE on probabilities, single EUP log, torch-style -100 clamp.
    p_sel = jnp.where(mask, pred_conf, 1.0 - pred_conf)
    bce = -jnp.maximum(jnp.log(p_sel), -100.0)                   # (1, T)
    if need_valid:
        bce = jnp.where(valid, bce, 0.0)

    # --- cls loss: softmax cross-entropy on positives (sum here, mean in wrapper).
    mmax = jnp.max(pred_cls, axis=0, keepdims=True)
    lse = mmax + jnp.log(jnp.sum(jnp.exp(pred_cls - mmax), axis=0, keepdims=True))
    cls_ids = jax.lax.broadcasted_iota(jnp.int32, pred_cls.shape, 0)
    tgt_idx = tgt_cls_f.astype(jnp.int32)
    picked = jnp.sum(jnp.where(cls_ids == tgt_idx, pred_cls, 0.0),
                     axis=0, keepdims=True)                      # (1, T)
    ce = jnp.where(mask, lse - picked, 0.0)

    # --- one cross-lane reduce per step (XLU/VALU have slack; kernel is
    #     DMA-bound), then a single unmasked full-block accumulate.
    coord_sum = jnp.sum(coord, axis=1, keepdims=True)            # (4, 1)
    npos = jnp.sum(mask_f, axis=1, keepdims=True)                # (1, 1)
    bce_sum = jnp.sum(bce, axis=1, keepdims=True)                # (1, 1)
    ce_sum = jnp.sum(ce, axis=1, keepdims=True)                  # (1, 1)
    zero = jnp.zeros((1, 1), jnp.float32)
    sums8 = jnp.concatenate([coord_sum, npos, bce_sum, ce_sum, zero], axis=0)  # (8, 1)
    out_ref[...] += jnp.broadcast_to(sums8, out_ref.shape)


def yolo_loss(predictions, targets):
    """JAX/Pallas equivalent of YOLOLoss.forward (num_classes inferred from shape)."""
    c_pred = predictions.shape[-1]
    c_tgt = targets.shape[-1]
    m_rows = predictions.size // c_pred

    # Channels-major (lane-dense) layout, kept in the NATIVE dtype.
    pred2 = jnp.transpose(predictions.reshape(m_rows, c_pred))   # (C_pred, M)
    tgt2 = jnp.transpose(targets.reshape(m_rows, c_tgt))         # (C_tgt, M)

    m128 = ((m_rows + 127) // 128) * 128
    tile_n = min(TILE_N_MAX, m128)
    n_tiles = -(-m_rows // tile_n)
    need_valid = (m_rows % tile_n) != 0

    kernel = functools.partial(_yolo_loss_kernel, m_rows=m_rows, tile_n=tile_n,
                               need_valid=need_valid)

    num_classes = c_pred - 5
    itemsize = jnp.dtype(predictions.dtype).itemsize
    cost = pl.CostEstimate(
        flops=m_rows * (8 * num_classes + 24),
        transcendentals=m_rows * (num_classes + 2),
        bytes_accessed=m_rows * (c_pred + c_tgt) * itemsize + 8 * 128 * 4)

    sums_block = pl.pallas_call(
        kernel,
        out_shape=jax.ShapeDtypeStruct((8, 128), jnp.float32),
        grid_spec=pl.GridSpec(
            grid=(n_tiles,),
            in_specs=[
                pl.BlockSpec((c_pred, tile_n), lambda i: (0, i)),
                pl.BlockSpec((c_tgt, tile_n), lambda i: (0, i)),
            ],
            out_specs=pl.BlockSpec((8, 128), lambda i: (0, 0)),
        ),
        compiler_params=pltpu.CompilerParams(
            dimension_semantics=("arbitrary",),
            # v5e's scoped-VMEM default is 16 MiB; 32 MiB gives the enlarged
            # double-buffered (13+5, 32768) working set (~6-8 MiB) ample headroom.
            vmem_limit_bytes=32 * 1024 * 1024),
        cost_estimate=cost,
    )(pred2, tgt2)

    sums = sums_block[:, 0]                     # every lane holds the same value
    coord_sse = jnp.sum(sums[0:4])
    num_pos = sums[4]
    bce_sum = sums[5]
    cls_sum = sums[6]

    # F.mse_loss(pred_boxes[mask], target_boxes[mask]): mean over num_pos*4 elems
    # (NaN when there are no positives, matching torch's mse_loss on empty input).
    coord_loss = coord_sse / (4.0 * num_pos)
    # BCE (on probabilities) mean over all cells.
    conf_loss = bce_sum / jnp.float32(m_rows)
    # cross_entropy mean over positives; 0.0 if there are none (reference branch).
    cls_loss = jnp.where(num_pos > 0.0, cls_sum / jnp.maximum(num_pos, 1.0), 0.0)

    total_loss = LAMBDA_COORD * coord_loss + conf_loss + cls_loss
    return {
        "total_loss": total_loss,
        "coord_loss": coord_loss,
        "conf_loss": conf_loss,
        "cls_loss": cls_loss,
    }


if __name__ == "__main__":
    key = jax.random.PRNGKey(0)
    k1, k2, k3, k4, k5 = jax.random.split(key, 5)

    B, H, W = 2, 16, 16
    # predictions: boxes (4) | confidence in (0,1) (1) | class logits (NUM_CLASSES)
    boxes = jax.random.normal(k1, (B, H, W, 4), dtype=jnp.float32)
    conf = jax.nn.sigmoid(jax.random.normal(k2, (B, H, W, 1), dtype=jnp.float32))
    cls_logits = jax.random.normal(k3, (B, H, W, NUM_CLASSES), dtype=jnp.float32)
    predictions = jnp.concatenate([boxes, conf, cls_logits], axis=-1)  # (2,16,16,13)

    # targets: class id in column 0 (0 = no object), boxes in columns 1:5
    tcls = jax.random.randint(k4, (B, H, W, 1), 0, NUM_CLASSES).astype(jnp.float32)
    tboxes = jax.random.normal(k5, (B, H, W, 4), dtype=jnp.float32)
    targets = jnp.concatenate([tcls, tboxes], axis=-1)  # (2,16,16,5)

    out = yolo_loss(predictions, targets)
    jax.block_until_ready(out)
    print("KERNEL_OK")
</pallas_src>

<mosaic_0001>
module attributes {stable_mosaic.version = 11 : i64} {
  func.func @_yolo_loss_kernel(%arg0: i32, %arg1: memref<13x512xf32, #tpu.memory_space<vmem>>, %arg2: memref<5x512xf32, #tpu.memory_space<vmem>>, %arg3: memref<8x128xf32, #tpu.memory_space<vmem>>) attributes {dimension_semantics = [#tpu.dimension_semantics<arbitrary>], iteration_bounds = array<i64: 1>, scalar_prefetch = 0 : i64, scratch_operands = 0 : i64, tpu.core_type = #tpu.core_type<tc>, window_params = [{transform_indices = @transform_0, window_bounds = array<i64: 13, 512>}, {transform_indices = @transform_1, window_bounds = array<i64: 5, 512>}, {pipeline_mode = #tpu.pipeline_mode<synchronous>, transform_indices = @transform_2, window_bounds = array<i64: 8, 128>}]} {
    %c0_i32 = arith.constant 0 : i32
    %0 = arith.cmpi eq, %arg0, %c0_i32 : i32
    %1 = arith.extui %0 : i1 to i32
    %c0_i32_0 = arith.constant 0 : i32
    %2 = arith.cmpi ne, %1, %c0_i32_0 : i32
    scf.if %2 {
      %cst_22 = arith.constant 0.000000e+00 : f32
      %63 = vector.broadcast %cst_22 : f32 to vector<8x128xf32>
      %c0_23 = arith.constant 0 : index
      %c0_24 = arith.constant 0 : index
      %64 = vector.load %arg3[%c0_23, %c0_24] : memref<8x128xf32, #tpu.memory_space<vmem>>, vector<8x128xf32>
      tpu.vector_store %arg3[%c0_23, %c0_24], %63 {strides = array<i32>} : memref<8x128xf32, #tpu.memory_space<vmem>>, vector<8x128xf32>,
    } else {
    }
    %c0 = arith.constant 0 : index
    %c0_1 = arith.constant 0 : index
    %3 = vector.load %arg1[%c0, %c0_1] : memref<13x512xf32, #tpu.memory_space<vmem>>, vector<13x512xf32>
    %c0_2 = arith.constant 0 : index
    %c0_3 = arith.constant 0 : index
    %4 = vector.load %arg2[%c0_2, %c0_3] : memref<5x512xf32, #tpu.memory_space<vmem>>, vector<5x512xf32>
    %5 = vector.extract_strided_slice %3 {offsets = [0, 0], sizes = [4, 512], strides = [1, 1]} : vector<13x512xf32> to vector<4x512xf32>
    %6 = vector.extract_strided_slice %3 {offsets = [4, 0], sizes = [1, 512], strides = [1, 1]} : vector<13x512xf32> to vector<1x512xf32>
    %7 = vector.extract_strided_slice %3 {offsets = [5, 0], sizes = [8, 512], strides = [1, 1]} : vector<13x512xf32> to vector<8x512xf32>
    %8 = vector.extract_strided_slice %4 {offsets = [0, 0], sizes = [1, 512], strides = [1, 1]} : vector<5x512xf32> to vector<1x512xf32>
    %9 = vector.extract_strided_slice %4 {offsets = [1, 0], sizes = [4, 512], strides = [1, 1]} : vector<5x512xf32> to vector<4x512xf32>
    %cst = arith.constant 0.000000e+00 : f32
    %10 = vector.broadcast %cst : f32 to vector<1x512xf32>
    %11 = arith.cmpf ogt, %8, %10 : vector<1x512xf32>
    %12 = arith.extui %11 : vector<1x512xi1> to vector<1x512xi32>
    %13 = arith.sitofp %12 : vector<1x512xi32> to vector<1x512xf32>
    %14 = arith.subf %5, %9 : vector<4x512xf32>
    %15 = arith.mulf %14, %14 : vector<4x512xf32>
    %cst_4 = arith.constant 0.000000e+00 : f32
    %16 = vector.shape_cast %11 : vector<1x512xi1> to vector<1x512xi1>
    %17 = vector.broadcast %16 : vector<1x512xi1> to vector<4x512xi1>
    %18 = vector.broadcast %cst_4 : f32 to vector<4x512xf32>
    %19 = arith.select %17, %15, %18 : vector<4x512xi1>, vector<4x512xf32>
    %cst_5 = arith.constant 1.000000e+00 : f32
    %20 = vector.broadcast %cst_5 : f32 to vector<1x512xf32>
    %21 = arith.subf %20, %6 : vector<1x512xf32>
    %22 = arith.select %11, %6, %21 : vector<1x512xi1>, vector<1x512xf32>
    %23 = math.log %22 : vector<1x512xf32>
    %cst_6 = arith.constant -1.000000e+02 : f32
    %24 = vector.broadcast %cst_6 : f32 to vector<1x512xf32>
    %25 = arith.maximumf %23, %24 : vector<1x512xf32>
    %cst_7 = arith.constant 0.000000e+00 : f32
    %26 = vector.broadcast %cst_7 : f32 to vector<1x512xf32>
    %27 = arith.subf %26, %25 : vector<1x512xf32>
    %cst_8 = arith.constant dense<0xFF800000> : vector<512xf32>
    %28 = vector.multi_reduction <maximumf>, %7, %cst_8 [0] : vector<8x512xf32> to vector<512xf32>
    %29 = vector.shape_cast %28 : vector<512xf32> to vector<1x512xf32>
    %30 = vector.broadcast %29 : vector<1x512xf32> to vector<8x512xf32>
    %31 = arith.subf %7, %30 : vector<8x512xf32>
    %32 = math.exp %31 : vector<8x512xf32>
    %cst_9 = arith.constant dense<0.000000e+00> : vector<512xf32>
    %33 = vector.multi_reduction <add>, %32, %cst_9 [0] : vector<8x512xf32> to vector<512xf32>
    %34 = vector.shape_cast %33 : vector<512xf32> to vector<1x512xf32>
    %35 = math.log %34 : vector<1x512xf32>
    %36 = arith.addf %29, %35 : vector<1x512xf32>
    %37 = tpu.iota {dimensions = array<i32: 0>} : vector<8x512xi32>
    %38 = arith.fptosi %8 : vector<1x512xf32> to vector<1x512xi32>
    %39 = vector.broadcast %38 : vector<1x512xi32> to vector<8x512xi32>
    %40 = arith.cmpi eq, %37, %39 : vector<8x512xi32>
    %cst_10 = arith.constant 0.000000e+00 : f32
    %41 = vector.broadcast %cst_10 : f32 to vector<8x512xf32>
    %42 = arith.select %40, %7, %41 : vector<8x512xi1>, vector<8x512xf32>
    %cst_11 = arith.constant dense<0.000000e+00> : vector<512xf32>
    %43 = vector.multi_reduction <add>, %42, %cst_11 [0] : vector<8x512xf32> to vector<512xf32>
    %44 = vector.shape_cast %43 : vector<512xf32> to vector<1x512xf32>
    %45 = arith.subf %36, %44 : vector<1x512xf32>
    %cst_12 = arith.constant 0.000000e+00 : f32
    %46 = vector.broadcast %cst_12 : f32 to vector<1x512xf32>
    %47 = arith.select %11, %45, %46 : vector<1x512xi1>, vector<1x512xf32>
    %cst_13 = arith.constant dense<0.000000e+00> : vector<4xf32>
    %48 = vector.multi_reduction <add>, %19, %cst_13 [1] : vector<4x512xf32> to vector<4xf32>
    %49 = vector.shape_cast %48 : vector<4xf32> to vector<4x1xf32>
    %cst_14 = arith.constant dense<0.000000e+00> : vector<1xf32>
    %50 = vector.multi_reduction <add>, %13, %cst_14 [1] : vector<1x512xf32> to vector<1xf32>
    %51 = vector.shape_cast %50 : vector<1xf32> to vector<1x1xf32>
    %cst_15 = arith.constant dense<0.000000e+00> : vector<1xf32>
    %52 = vector.multi_reduction <add>, %27, %cst_15 [1] : vector<1x512xf32> to vector<1xf32>
    %53 = vector.shape_cast %52 : vector<1xf32> to vector<1x1xf32>
    %cst_16 = arith.constant dense<0.000000e+00> : vector<1xf32>
    %54 = vector.multi_reduction <add>, %47, %cst_16 [1] : vector<1x512xf32> to vector<1xf32>
    %55 = vector.shape_cast %54 : vector<1xf32> to vector<1x1xf32>
    %cst_17 = arith.constant 0.000000e+00 : f32
    %56 = vector.broadcast %cst_17 : f32 to vector<1x1xf32>
    %57 = tpu.concatenate %49, %51, %53, %55, %56 in 0 : vector<4x1xf32>, vector<1x1xf32>, vector<1x1xf32>, vector<1x1xf32>, vector<1x1xf32> -> vector<8x1xf32>
    %c0_18 = arith.constant 0 : index
    %c0_19 = arith.constant 0 : index
    %58 = vector.load %arg3[%c0_18, %c0_19] : memref<8x128xf32, #tpu.memory_space<vmem>>, vector<8x128xf32>
    %59 = vector.shape_cast %57 : vector<8x1xf32> to vector<8x1xf32>
    %60 = vector.broadcast %59 : vector<8x1xf32> to vector<8x128xf32>
    %61 = arith.addf %58, %60 : vector<8x128xf32>
    %c0_20 = arith.constant 0 : index
    %c0_21 = arith.constant 0 : index
    %62 = vector.load %arg3[%c0_20, %c0_21] : memref<8x128xf32, #tpu.memory_space<vmem>>, vector<8x128xf32>
    tpu.vector_store %arg3[%c0_20, %c0_21], %61 {strides = array<i32>} : memref<8x128xf32, #tpu.memory_space<vmem>>, vector<8x128xf32>,
    return
  }
  func.func @transform_0(%arg0: i32) -> (i32, i32) {
    %c0_i32 = arith.constant 0 : i32
    %c0_i32_0 = arith.constant 0 : i32
    return %c0_i32, %arg0 : i32, i32
  }
  func.func @transform_1(%arg0: i32) -> (i32, i32) {
    %c0_i32 = arith.constant 0 : i32
    %c0_i32_0 = arith.constant 0 : i32
    return %c0_i32, %arg0 : i32, i32
  }
  func.func @transform_2(%arg0: i32) -> (i32, i32) {
    %c0_i32 = arith.constant 0 : i32
    %c0_i32_0 = arith.constant 0 : i32
    %c0_i32_1 = arith.constant 0 : i32
    return %c0_i32, %c0_i32_0 : i32, i32
  }
}

</mosaic_0001>

<bundles_post_ra>
// kernel: tpu_custom_call.1
= control target key start
LH: loop header
LB: loop body
LE: loop exit
PB: predicated region body
PF: predicated region fallthrough
CT: control target
= control target key end

     0   :  { %7 = vsyncpa [#allocation3], 0  ;;  %s813_s0 = inlined_call_operand.hbm [shape: f32[13,512], index: 0, kind: input, shape index: {}]   ;;  %s814_s1 = inlined_call_operand.hbm [shape: f32[5,512], index: 1, kind: input, shape index: {}]   ;;  %s815_s2 = inlined_call_operand.hbm [shape: f32[8,128], index: 2, kind: output, shape index: {}]  }
   0x1   :  { %8 = vsyncpa [#allocation6], 0 }
   0x2   :  { %9 = vsyncpa [#allocation4], 0  ;;  %s14_s11 = sshll.u32 %s813_s0, 4  ;;  %s566_s12 = smov [#allocation2]   ;;  %s15_s11 = int_to_ptr.hbm [resolvable:$true] %s14_s11 }
   0x3   :  { %s16_s13 = sshll.u32 %s566_s12, 4  ;;  %s28_s16 = sshll.u32 %s814_s1, 4  ;;  %s17_s13 = int_to_ptr.vmem [resolvable:$true] %s16_s13  ;;  %s29_s16 = int_to_ptr.hbm [resolvable:$true] %s28_s16 }
   0x4   :  { %s567_s17 = smov 512   ;;  %s568_s18 = smov 32  }
   0x5   :  { %22 = dma.hbm_to_vmem [thread:$0]  %s15_s11, 1024, %s17_s13, [#allocation3], %s567_s17, %s567_s17, %s568_s18  }
   0x6   :  { %s569_s19 = smov [#allocation5]  }
   0x7   :  { %s30_s20 = sshll.u32 %s569_s19, 4  ;;  %s31_s20 = int_to_ptr.vmem [resolvable:$true] %s30_s20 }
   0x8   :  { %33 = dma.hbm_to_vmem [thread:$0]  %s29_s16, 512, %s31_s20, [#allocation6]  }
   0x9   :  { %560 = dma.done.wait [#allocation3], 1024  }
   0xa   :  { %561 = vsyncadd [#allocation3], 4294966272 }
   0xb   :  { %562 = dma.done.wait [#allocation6], 512  }
   0xc   :  { %563 = vsyncadd [#allocation6], 4294966784  ;;  %v594_v0 = vld [vmem:[#allocation5] sm:$0x1f]  ;;  %v596_v1 = vld [vmem:[#allocation5 + $0x8] sm:$0x1f] }
   0xd   :  { %v598_v2 = vld [vmem:[#allocation5 + $0x10] sm:$0x1f]  ;;  %v600_v3 = vld [vmem:[#allocation5 + $0x18] sm:$0x1f]  ;;  %vm59_vm0 = vcmp.gt.f32.partialorder %v594_v0, 0.0  ;;  %vm60_vm1 = vcmp.gt.f32.partialorder %v596_v1, 0.0  ;;  %v428_v9 = vceil.f32 %v594_v0  ;;  %v429_v10 = vfloor.f32 %v594_v0 }
   0xe   :  { %vm61_vm2 = vcmp.gt.f32.partialorder %v598_v2, 0.0  ;;  %vm354_vm3 = vcmask 1040384   ;;  %vm62_vm4 = vcmp.gt.f32.partialorder %v600_v3, 0.0  ;;  %v570_v4 = vmov 0.0   ;;  %v621_v16 = vld [vmem:[#allocation2] sm:$0xff]  ;;  %v627_v21 = vld [vmem:[#allocation2 + $0x8] sm:$0xff] }
   0xf   :  { %v423_v5 = vsel %vm59_vm0, 1.0, %v570_v4  ;;  %v424_v6 = vsel %vm60_vm1, 1.0, %v570_v4  ;;  %v425_v7 = vsel %vm61_vm2, 1.0, %v570_v4  ;;  %v426_v8 = vsel %vm62_vm4, 1.0, %v570_v4  ;;  %v629_v22 = vld [vmem:[#allocation2 + $0x10] sm:$0xff]  ;;  %v631_v24 = vld [vmem:[#allocation2 + $0x18] sm:$0xff] }
  0x10   :  { %v433_v11 = vceil.f32 %v596_v1  ;;  %v434_v12 = vfloor.f32 %v596_v1  ;;  %v438_v13 = vceil.f32 %v598_v2  ;;  %v439_v14 = vfloor.f32 %v598_v2  ;;  %s572_s0 = smov [#allocation7]   ;;  %s412_s23 = sshll.u32 %s815_s2, 4  ;;  %s413_s23 = int_to_ptr.hbm [resolvable:$true] %s412_s23 }
  0x11   :  { %v443_v15 = vceil.f32 %v600_v3  ;;  %v355_v17 = vsel %vm354_vm3, %v423_v5, 0.0  ;;  %v356_v18 = vsel %vm354_vm3, %v424_v6, 0.0  ;;  %v358_v19 = vsel %vm354_vm3, %v425_v7, 0.0  ;;  %s410_s1 = sshll.u32 %s572_s0, 4  ;;  %s411_s1 = int_to_ptr.vmem [resolvable:$true] %s410_s1 }
  0x12   :  { %v360_v20 = vsel %vm354_vm3, %v426_v8, 0.0  ;;  %v357_v23 = vadd.f32 %v356_v18, %v355_v17  ;;  %v103_v25 = vsub.f32 1.0, %v621_v16  ;;  %v104_v26 = vsub.f32 1.0, %v627_v21  ;;  %v679_v17 = vld [vmem:[#allocation2 + $0x20] sm:$0x1f] }
  0x13   :  { %v105_v27 = vsub.f32 1.0, %v629_v22  ;;  %v106_v28 = vsub.f32 1.0, %v631_v24  ;;  %v111_v29 = vrot.slane %v621_v16, 4  ;;  %v112_v30 = vrot.slane %v627_v21, 4 }
  0x14   :  { %v113_v31 = vrot.slane %v629_v22, 4  ;;  %v359_v32 = vadd.f32 %v358_v19, %v357_v23  ;;  %v114_v33 = vrot.slane %v631_v24, 4  ;;  %v123_v34 = vrot.slane %v103_v25, 4 }
  0x15   :  { %v124_v35 = vrot.slane %v104_v26, 4  ;;  %v125_v36 = vrot.slane %v105_v27, 4  ;;  %v126_v37 = vrot.slane %v106_v28, 4  ;;  %v75_v38 = vrot.slane %v594_v0, 1 }
  0x16   :  { %v361_v39 = vadd.f32 %v360_v20, %v359_v32  ;;  %v131_v40 = vsel %vm59_vm0, %v111_v29, %v123_v34  ;;  %v571_v42 = vmov 0   ;;  %vm151_vm5 = vcmask 1047557  }
  0x17   :  { %v132_v41 = vsel %vm60_vm1, %v112_v30, %v124_v35  ;;  %v63_v43 = vsel %vm59_vm0, 1, %v571_v42  ;;  %454 = vset.pattern.permute.xlu2 %v571_v42  ;;  %455 = vset.pattern.permute.xlu0 %v571_v42  ;;  %v133_v44 = vsel %vm61_vm2, %v113_v31, %v125_v36  ;;  %v134_v45 = vsel %vm62_vm4, %v114_v33, %v126_v37 }
  0x18   :  { %456 = vlog2.f32 %v131_v40  ;;  %v64_v46 = vsel %vm60_vm1, 1, %v571_v42  ;;  %vm153_vm6 = vcmask 1044480   ;;  %362 = vadd.xlane.f32.xlu0 %v361_v39  ;;  %v65_v47 = vsel %vm61_vm2, 1, %v571_v42  ;;  %v695_v39 = vld [vmem:[#allocation2 + $0x28] sm:$0x1f] }
  0x19   :  { %458 = vlog2.f32 %v132_v41  ;;  %v66_v48 = vsel %vm62_vm4, 1, %v571_v42  ;;  %v76_v49 = vrot.slane %v596_v1, 1  ;;  %v77_v50 = vrot.slane %v598_v2, 1 }
  0x1a   :  { %460 = vlog2.f32 %v133_v44  ;;  %v78_v51 = vrot.slane %v600_v3, 1  ;;  %v83_v52 = vsub.f32 %v621_v16, %v75_v38  ;;  %v91_v54 = vperm.slane %v63_v43, 0 }
  0x1b   :  { %462 = vlog2.f32 %v134_v45  ;;  %v84_v53 = vsub.f32 %v627_v21, %v76_v49  ;;  %v92_v55 = vperm.slane %v64_v46, 0  ;;  %v85_v56 = vsub.f32 %v629_v22, %v77_v50  ;;  %v702_v50 = vld [vmem:[#allocation2 + $0x30] sm:$0x1f] }
  0x1c   :  { %v86_v57 = vsub.f32 %v631_v24, %v78_v51  ;;  %v87_v58 = vmul.f32 %v83_v52, %v83_v52  ;;  %v93_v59 = vperm.slane %v65_v47, 0  ;;  %v94_v61 = vperm.slane %v66_v48, 0 }
  0x1d   :  { %v88_v60 = vmul.f32 %v84_v53, %v84_v53  ;;  %vm665_vm7 = vcmp.eq.s32.totalorder %v91_v54, 1  ;;  %vm669_vm8 = vcmp.eq.s32.totalorder %v92_v55, 1  ;;  %v89_v5 = vmul.f32 %v85_v56, %v85_v56  ;;  %v709_v56 = vld [vmem:[#allocation2 + $0x38] sm:$0x1f] }
  0x1e   :  { %v457_v4 = vpop.eup %456  ;;  %v90_v6 = vmul.f32 %v86_v57, %v86_v57  ;;  %vm673_vm9 = vcmp.eq.s32.totalorder %v93_v59, 1  ;;  %v99_v8 = vsel %vm665_vm7, %v87_v58, 0.0  ;;  %vm681_vm10 = vcmp.eq.s32.totalorder %v94_v61, 1 }
  0x1f   :  { %v459_v18 = vpop.eup %458  ;;  %v136_v19 = vmul.f32 0.6931472, %v457_v4  ;;  %v100_v23 = vsel %vm669_vm8, %v88_v60, 0.0  ;;  %vm344_vm11 = vcmask 1043456   ;;  %v101_v27 = vsel %vm673_vm9, %v89_v5, 0.0 }
  0x20   :  { %v461_v25 = vpop.eup %460  ;;  %v138_v26 = vmul.f32 0.6931472, %v459_v18  ;;  %v102_v28 = vsel %vm681_vm10, %v90_v6, 0.0  ;;  %v345_v29 = vsel %vm344_vm11, %v99_v8, 0.0  ;;  %v346_v33 = vsel %vm344_vm11, %v100_v23, 0.0 }
  0x21   :  { %v463_v30 = vpop.eup %462  ;;  %v140_v31 = vmul.f32 0.6931472, %v461_v25  ;;  %v143_v32 = vmax.f32 %v136_v19, -100.0  ;;  %v348_v34 = vsel %vm344_vm11, %v101_v27, 0.0  ;;  %v347_v37 = vadd.f32 %v346_v33, %v345_v29 }
  0x22   :  { %v142_v35 = vmul.f32 0.6931472, %v463_v30  ;;  %v144_v36 = vmax.f32 %v138_v26, -100.0  ;;  %v350_v38 = vsel %vm344_vm11, %v102_v28, 0.0  ;;  %v152_v42 = vsel %vm151_vm5, %v621_v16, -inf }
  0x23   :  { %v145_v40 = vmax.f32 %v140_v31, -100.0  ;;  %v147_v41 = vsub.f32 0.0, %v143_v32  ;;  %v154_v43 = vsel %vm153_vm6, %v679_v17, -inf  ;;  %v349_v46 = vadd.f32 %v348_v34, %v347_v37 }
  0x24   :  { %v146_v44 = vmax.f32 %v142_v35, -100.0  ;;  %v148_v45 = vsub.f32 0.0, %v144_v36  ;;  %v155_v47 = vmax.f32 %v152_v42, %v154_v43  ;;  %v162_v51 = vsel %vm151_vm5, %v627_v21, -inf }
  0x25   :  { %v149_v48 = vsub.f32 0.0, %v145_v40  ;;  %v364_v49 = vsel %vm354_vm3, %v147_v41, 0.0  ;;  %v163_v52 = vsel %vm153_vm6, %v695_v39, -inf  ;;  %v351_v55 = vadd.f32 %v350_v38, %v349_v46 }
  0x26   :  { %v150_v53 = vsub.f32 0.0, %v146_v44  ;;  %v365_v54 = vsel %vm354_vm3, %v148_v45, 0.0  ;;  %v156_v57 = vrot.slane %v155_v47, 4  ;;  %v164_v60 = vmax.f32 %v162_v51, %v163_v52 }
  0x27   :  { %v366_v58 = vadd.f32 %v365_v54, %v364_v49  ;;  %v367_v59 = vsel %vm354_vm3, %v149_v48, 0.0  ;;  %v171_v61 = vsel %vm151_vm5, %v629_v22, -inf  ;;  %352 = vadd.xlane.f32.xlu1 %v351_v55  ;;  %v172_v4 = vsel %vm153_vm6, %v702_v50, -inf }
  0x28   :  { %v369_v62 = vsel %vm354_vm3, %v150_v53, 0.0  ;;  %v157_v63 = vmax.f32 %v155_v47, %v156_v57  ;;  %v180_v5 = vsel %vm151_vm5, %v631_v24, -inf  ;;  %v165_v7 = vrot.slane %v164_v60, 4 }
  0x29   :  { %v368_v6 = vadd.f32 %v367_v59, %v366_v58  ;;  %v173_v8 = vmax.f32 %v171_v61, %v172_v4  ;;  %v181_v18 = vsel %vm153_vm6, %v709_v56, -inf  ;;  %v444_v19 = vfloor.f32 %v600_v3 }
  0x2a   :  { %v158_v20 = vrot.slane %v157_v63, 2  ;;  %v182_v23 = vmax.f32 %v180_v5, %v181_v18  ;;  %v274_v25 = vlaneseq  ;;  %v166_v27 = vmax.f32 %v164_v60, %v165_v7 }
  0x2b   :  { %v370_v26 = vadd.f32 %v369_v62, %v368_v6  ;;  %v174_v28 = vrot.slane %v173_v8, 4  ;;  %vm427_vm12 = vcmp.lt.s32.totalorder %v594_v0, 0  ;;  %vm432_vm13 = vcmp.lt.s32.totalorder %v596_v1, 0 }
  0x2c   :  { %v159_v29 = vmax.f32 %v157_v63, %v158_v20  ;;  %v183_v30 = vrot.slane %v182_v23, 4  ;;  %v723_v31 = vshrl.u32 %v274_v25, 7  ;;  %v430_v32 = vsel %vm427_vm12, %v428_v9, %v429_v10 }
  0x2d   :  { %371 = vadd.xlane.f32.xlu0 %v370_v26  ;;  %v167_v33 = vrot.slane %v166_v27, 2  ;;  %v175_v34 = vmax.f32 %v173_v8, %v174_v28  ;;  %v431_v35 = vcvt.f32.s32 %v430_v32  ;;  %v435_v38 = vsel %vm432_vm13, %v433_v11, %v434_v12 }
  0x2e   :  { %v160_v36 = vrot.slane %v159_v29, 1  ;;  %v184_v37 = vmax.f32 %v182_v23, %v183_v30  ;;  %vm437_vm14 = vcmp.lt.s32.totalorder %v598_v2, 0  ;;  %v436_v42 = vcvt.f32.s32 %v435_v38 }
  0x2f   :  { %v168_v40 = vmax.f32 %v166_v27, %v167_v33  ;;  %v176_v41 = vrot.slane %v175_v34, 2  ;;  %v440_v9 = vsel %vm437_vm14, %v438_v13, %v439_v14  ;;  %vm442_vm15 = vcmp.lt.s32.totalorder %v600_v3, 0 }
  0x30   :  { %v739_v10 = vmax.f32 %v159_v29, %v160_v36  ;;  %v185_v43 = vrot.slane %v184_v37, 2  ;;  %v441_v44 = vcvt.f32.s32 %v440_v9  ;;  %v445_v11 = vsel %vm442_vm15, %v443_v15, %v444_v19 }
  0x31   :  { %v169_v45 = vrot.slane %v168_v40, 1  ;;  %v177_v46 = vmax.f32 %v175_v34, %v176_v41  ;;  %v280_v12 = vperm.slane %v431_v35, 0  ;;  %v446_v13 = vcvt.f32.s32 %v445_v11 }
  0x32   :  { %v186_v47 = vmax.f32 %v184_v37, %v185_v43  ;;  %v189_v48 = vsub.f32 %v621_v16, %v739_v10  ;;  %v193_v49 = vsub.f32 %v679_v17, %v739_v10  ;;  %vm221_vm5 = vcmask 1042432  }
  0x33   :  { %v748_v14 = vmax.f32 %v168_v40, %v169_v45  ;;  %v178_v51 = vrot.slane %v177_v46, 1  ;;  %v281_v55 = vperm.slane %v436_v42, 0  ;;  %v282_v59 = vperm.slane %v441_v44, 0 }
  0x34   :  { %v187_v52 = vrot.slane %v186_v47, 1  ;;  %v197_v53 = vmul.f32 1.442695, %v189_v48  ;;  %v205_v54 = vmul.f32 1.442695, %v193_v49  ;;  %v283_v61 = vperm.slane %v446_v13, 0 }
  0x35   :  { %v750_v57 = vmax.f32 %v177_v46, %v178_v51  ;;  %v190_v15 = vsub.f32 %v627_v21, %v748_v14  ;;  %v194_v58 = vsub.f32 %v695_v39, %v748_v14  ;;  %vm284_vm7 = vcmp.eq.s32.totalorder %v723_v31, %v280_v12 }
  0x36   :  { %v756_v60 = vmax.f32 %v186_v47, %v187_v52  ;;  %464 = vpow2.f32 %v197_v53  ;;  %vm285_vm8 = vcmp.eq.s32.totalorder %v723_v31, %v281_v55  ;;  %v292_v19 = vrot.slane %v621_v16, 5 }
  0x37   :  { %v191_v62 = vsub.f32 %v629_v22, %v750_v57  ;;  %v195_v63 = vsub.f32 %v702_v50, %v750_v57  ;;  %v199_v4 = vmul.f32 1.442695, %v190_v15  ;;  %466 = vpow2.f32 %v205_v54 }
  0x38   :  { %v192_v5 = vsub.f32 %v631_v24, %v756_v60  ;;  %v196_v6 = vsub.f32 %v709_v56, %v756_v60  ;;  %v207_v7 = vmul.f32 1.442695, %v194_v58  ;;  %v293_v25 = vrot.slane %v679_v17, 5 }
  0x39   :  { %468 = vpow2.f32 %v199_v4  ;;  %v201_v8 = vmul.f32 1.442695, %v191_v62  ;;  %v209_v18 = vmul.f32 1.442695, %v195_v63  ;;  %v295_v26 = vrot.slane %v627_v21, 5 }
  0x3a   :  { %v203_v20 = vmul.f32 1.442695, %v192_v5  ;;  %470 = vpow2.f32 %v207_v7  ;;  %v211_v23 = vmul.f32 1.442695, %v196_v6  ;;  %v296_v27 = vrot.slane %v695_v39, 5 }
  0x3b   :  { %472 = vpow2.f32 %v201_v8  ;;  %v298_v28 = vrot.slane %v629_v22, 5  ;;  %v294_v30 = vsel %vm221_vm5, %v292_v19, %v293_v25  ;;  %v299_v32 = vrot.slane %v702_v50, 5 }
  0x3c   :  { %v465_v29 = vpop.eup %464  ;;  %474 = vpow2.f32 %v203_v20  ;;  %v301_v16 = vrot.slane %v631_v24, 5  ;;  %v297_v17 = vsel %vm221_vm5, %v295_v26, %v296_v27  ;;  %v302_v35 = vrot.slane %v709_v56, 5 }
  0x3d   :  { %v467_v33 = vpop.eup %466  ;;  %476 = vpow2.f32 %v209_v18  ;;  %v222_v34 = vrot.slane %v465_v29, 5  ;;  %v308_v22 = vsel %vm284_vm7, %v294_v30, 0.0  ;;  %vm286_vm9 = vcmp.eq.s32.totalorder %v723_v31, %v282_v59 }
  0x3e   :  { %478 = vpow2.f32 %v211_v23  ;;  %v223_v21 = vrot.slane %v467_v33, 5  ;;  %v309_v50 = vsel %vm285_vm8, %v297_v17, 0.0  ;;  %v300_v38 = vsel %vm221_vm5, %v298_v28, %v299_v32 }
  0x3f   :  { %v469_v39 = vpop.eup %468  ;;  %v312_v40 = vrot.slane %v308_v22, 4  ;;  %vm287_vm10 = vcmp.eq.s32.totalorder %v723_v31, %v283_v61  ;;  %v303_v9 = vsel %vm221_vm5, %v301_v16, %v302_v35  ;;  %v318_v45 = vrot.slane %v309_v50, 4 }
  0x40   :  { %v471_v36 = vpop.eup %470  ;;  %v224_v24 = vsel %vm221_vm5, %v222_v34, %v223_v21  ;;  %v225_v37 = vrot.slane %v469_v39, 5  ;;  %v310_v48 = vsel %vm286_vm9, %v300_v38, 0.0  ;;  %v311_v52 = vsel %vm287_vm10, %v303_v9, 0.0 }
  0x41   :  { %v473_v41 = vpop.eup %472  ;;  %v226_v56 = vrot.slane %v471_v36, 5  ;;  %v238_v42 = vrot.slane %v224_v24, 4  ;;  %v313_v53 = vadd.f32 %v312_v40, %v308_v22  ;;  %v319_v61 = vadd.f32 %v318_v45, %v309_v50 }
  0x42   :  { %v475_v43 = vpop.eup %474  ;;  %v228_v44 = vrot.slane %v473_v41, 5  ;;  %v324_v62 = vrot.slane %v310_v48, 4  ;;  %v330_v6 = vrot.slane %v311_v52, 4 }
  0x43   :  { %v477_v46 = vpop.eup %476  ;;  %v227_v11 = vsel %vm221_vm5, %v225_v37, %v226_v56  ;;  %v231_v12 = vrot.slane %v475_v43, 5  ;;  %v239_v47 = vadd.f32 %v238_v42, %v224_v24  ;;  %v314_v59 = vrot.slane %v313_v53, 2 }
  0x44   :  { %v479_v49 = vpop.eup %478  ;;  %v229_v13 = vrot.slane %v477_v46, 5  ;;  %v244_v51 = vrot.slane %v227_v11, 4  ;;  %v325_v23 = vadd.f32 %v324_v62, %v310_v48  ;;  %v320_v27 = vrot.slane %v319_v61, 2 }
  0x45   :  { %v232_v54 = vrot.slane %v479_v49, 5  ;;  %v240_v55 = vrot.slane %v239_v47, 2  ;;  %v331_v28 = vadd.f32 %v330_v6, %v311_v52  ;;  %v315_v32 = vadd.f32 %v314_v59, %v313_v53 }
  0x46   :  { %v230_v15 = vsel %vm221_vm5, %v228_v44, %v229_v13  ;;  %v245_v58 = vadd.f32 %v244_v51, %v227_v11  ;;  %v326_v17 = vrot.slane %v325_v23, 2  ;;  %v321_v21 = vadd.f32 %v320_v27, %v319_v61 }
  0x47   :  { %v233_v63 = vsel %vm221_vm5, %v231_v12, %v232_v54  ;;  %v241_v4 = vadd.f32 %v240_v55, %v239_v47  ;;  %v250_v5 = vrot.slane %v230_v15, 4  ;;  %v332_v22 = vrot.slane %v331_v28, 2 }
  0x48   :  { %v246_v7 = vrot.slane %v245_v58, 2  ;;  %v256_v31 = vrot.slane %v233_v63, 4  ;;  %v316_v50 = vrot.slane %v315_v32, 1  ;;  %v327_v37 = vadd.f32 %v326_v17, %v325_v23 }
  0x49   :  { %v242_v8 = vrot.slane %v241_v4, 1  ;;  %v251_v18 = vadd.f32 %v250_v5, %v230_v15  ;;  %v322_v40 = vrot.slane %v321_v21, 1  ;;  %v333_v41 = vadd.f32 %v332_v22, %v331_v28 }
  0x4a   :  { %v247_v19 = vadd.f32 %v246_v7, %v245_v58  ;;  %v257_v20 = vadd.f32 %v256_v31, %v233_v63  ;;  %v317_v42 = vadd.f32 %v316_v50, %v315_v32  ;;  %v328_v44 = vrot.slane %v327_v37, 1 }
  0x4b   :  { %v243_v25 = vadd.f32 %v242_v8, %v241_v4  ;;  %v252_v26 = vrot.slane %v251_v18, 2  ;;  %v323_v46 = vadd.f32 %v322_v40, %v321_v21  ;;  %v334_v11 = vrot.slane %v333_v41, 1 }
  0x4c   :  { %v248_v29 = vrot.slane %v247_v19, 1  ;;  %v258_v30 = vrot.slane %v257_v20, 2  ;;  %v329_v51 = vadd.f32 %v328_v44, %v327_v37 }
  0x4d   :  { %v253_v16 = vadd.f32 %v252_v26, %v251_v18  ;;  %480 = vlog2.f32 %v243_v25  ;;  %v335_v54 = vadd.f32 %v334_v11, %v333_v41 }
  0x4e   :  { %v249_v33 = vadd.f32 %v248_v29, %v247_v19  ;;  %v259_v34 = vadd.f32 %v258_v30, %v257_v20 }
  0x4f   :  { %v254_v35 = vrot.slane %v253_v16, 1 }
  0x50   :  { %v260_v39 = vrot.slane %v259_v34, 1  ;;  %482 = vlog2.f32 %v249_v33 }
  0x51   :  { %v255_v36 = vadd.f32 %v254_v35, %v253_v16 }
  0x52   :  { %v261_v24 = vadd.f32 %v260_v39, %v259_v34 }
  0x53   :  { %v481_v38 = vpop.eup %480  ;;  %484 = vlog2.f32 %v255_v36 }
  0x54   :  { %v263_v56 = vmul.f32 0.6931472, %v481_v38  ;;  %486 = vlog2.f32 %v261_v24 }
  0x56   :  { %v483_v9 = vpop.eup %482  ;;  %v270_v43 = vadd.f32 %v263_v56, %v739_v10 }
  0x57   :  { %v265_v45 = vmul.f32 0.6931472, %v483_v9 }
  0x58   :  { %v336_v12 = vsub.f32 %v270_v43, %v317_v42 }
  0x59   :  { %v485_v47 = vpop.eup %484  ;;  %v271_v48 = vadd.f32 %v265_v45, %v748_v14 }
  0x5a   :  { %v487_v49 = vpop.eup %486  ;;  %v267_v13 = vmul.f32 0.6931472, %v485_v47  ;;  %v340_v52 = vsel %vm59_vm0, %v336_v12, 0.0  ;;  %vm393_vm0 = vcmask 1045504  }
  0x5b   :  { %v269_v53 = vmul.f32 0.6931472, %v487_v49  ;;  %v337_v55 = vsub.f32 %v271_v48, %v323_v46  ;;  %v373_v10 = vsel %vm354_vm3, %v340_v52, 0.0 }
  0x5c   :  { %v272_v15 = vadd.f32 %v267_v13, %v750_v57 }
  0x5d   :  { %v273_v58 = vadd.f32 %v269_v53, %v756_v60  ;;  %v341_v61 = vsel %vm60_vm1, %v337_v55, 0.0  ;;  %vm395_vm1 = vcmask 1046528  }
  0x5e   :  { %v338_v62 = vsub.f32 %v272_v15, %v329_v51  ;;  %v374_v14 = vsel %vm354_vm3, %v341_v61, 0.0 }
  0x5f   :  { %v339_v63 = vsub.f32 %v273_v58, %v335_v54  ;;  %v375_v4 = vadd.f32 %v374_v14, %v373_v10 }
  0x60   :  { %v342_v0 = vsel %vm61_vm2, %v338_v62, 0.0 }
  0x61   :  { %v343_v5 = vsel %vm62_vm4, %v339_v63, 0.0  ;;  %v376_v57 = vsel %vm354_vm3, %v342_v0, 0.0 }
  0x62   :  { %v377_v6 = vadd.f32 %v376_v57, %v375_v4  ;;  %v378_v7 = vsel %vm354_vm3, %v343_v5, 0.0 }
  0x64   :  { %v379_v60 = vadd.f32 %v378_v7, %v377_v6 }
  0x66   :  { %380 = vadd.xlane.f32.xlu1 %v379_v60 }
  0x8b   :  { %v363_v1 = vpop.xlane.xlu0 %362 }
  0x8c   :  { %v383_v59 = vrot.slane %v363_v1, 4 }
  0x9a   :  { %v353_v31 = vpop.xlane.xlu1 %352 }
  0x9b   :  { %v391_v19 = vsel %vm344_vm11, %v353_v31, %v383_v59 }
  0xa0   :  { %v372_v8 = vpop.xlane.xlu0 %371 }
  0xa1   :  { %v386_v18 = vrot.slane %v372_v8, 3 }
  0xa3   :  { %v392_v3 = vsel %vm153_vm6, %v391_v19, %v386_v18 }
  0xd9   :  { %v381_v20 = vpop.xlane.xlu1 %380 }
  0xda   :  { %v389_v2 = vrot.slane %v381_v20, 2 }
  0xdc   :  { %v394_v23 = vsel %vm393_vm0, %v392_v3, %v389_v2 }
  0xdd   :  { %v396_v25 = vsel %vm395_vm1, %v394_v23, 0.0 }
  0xde   :  { %400 = vperm.xlu2 %454, %v396_v25  }
 0x138   :  { %v401_v26 = vpop.permute.xlu2 %400 }
 0x139   :  { %404 = vst [vmem:[#allocation7] sm:$0xff] %v401_v26 }
 0x13a   :  { %415 = dma.vmem_to_hbm [thread:$0]  %s411_s1, 128, %s413_s23, [#allocation4]  }
 0x13b   :  { %564 = dma.done.wait [#allocation4], 128  }
 0x13c   :  { %565 = vsyncadd [#allocation4], 4294967168 }
 0x13d   :  { %420 = vsyncpa [#allocation3], 1 }
 0x13e   :  { %421 = vsyncpa [#allocation6], 1 }
 0x13f   :  { %422 = vsyncpa [#allocation4], 1 }

</bundles_post_ra>
